<compile_context>
chip_gen: v7x
topology: tpu7x:2x2x1
jax: 0.10.0
libtpu: 0.0.40
codegen_flags: <defaults>
</compile_context>

<pallas_src>
import jax
import jax.numpy as jnp
from jax.experimental import pallas as pl
from jax.experimental.pallas import tpu as pltpu

VOCAB = 10
DIM = 300
LANES = 128
# 512 rows x 128 lanes: idx (int32) + out (f32) ~ 512 KiB per block (double-buffered ~1 MiB)
# -> comfortably inside default scoped VMEM on v5e/v6e/v7x while amortizing per-step overhead.
MAX_TILE_ROWS = 512


def _lookup_kernel(tbl_ref, idx_ref, out_ref):
    # tbl_ref: (VOCAB,) f32 in SMEM  -- precollapsed relu(emb) @ w + b
    # idx_ref: (tile_rows, LANES) int32 in VMEM
    # out_ref: (tile_rows, LANES) f32 in VMEM
    idx = idx_ref[...]
    result = jnp.zeros(idx.shape, jnp.float32)
    # Unrolled 10-way select on the VPU; scalars come from SMEM (no per-iter DMA).
    # Note: out-of-range / negative indices silently map to 0.0 (PyTorch would raise).
    for v in range(VOCAB):
        result = jnp.where(idx == v, tbl_ref[v], result)
    out_ref[...] = result


def _round_up(x, m):
    return ((x + m - 1) // m) * m


def emb_model_forward(indices, emb_table, lin_w, lin_b):
    """indices: (B, S) int; returns (B, S) f32 — matches EmbModel.forward in eval mode."""
    B, S = indices.shape
    N = B * S

    # Algebraic collapse (eval-mode dropout == identity): 10 scalars, computed once.
    tbl = (
        jnp.maximum(emb_table.astype(jnp.float32), 0.0)
        @ lin_w.reshape(DIM).astype(jnp.float32)
        + lin_b.reshape(()).astype(jnp.float32)
    )  # (VOCAB,)

    # Lane-dense layout: pack indices into a (rows, 128) int32 slab (pad with index 0).
    rows_needed = max(pl.cdiv(N, LANES), 1)
    tile_rows = min(MAX_TILE_ROWS, _round_up(rows_needed, 8))
    rows_total = _round_up(rows_needed, tile_rows)
    total = rows_total * LANES

    idx_flat = jnp.zeros((total,), dtype=jnp.int32).at[:N].set(
        indices.reshape(-1).astype(jnp.int32)
    )
    idx_slab = idx_flat.reshape(rows_total, LANES)

    out = pl.pallas_call(
        _lookup_kernel,
        out_shape=jax.ShapeDtypeStruct((rows_total, LANES), jnp.float32),
        grid=(rows_total // tile_rows,),
        in_specs=[
            pl.BlockSpec(memory_space=pltpu.SMEM),               # 10-entry table (untiled)
            pl.BlockSpec((tile_rows, LANES), lambda i: (i, 0)),  # index slab
        ],
        out_specs=pl.BlockSpec((tile_rows, LANES), lambda i: (i, 0)),
        compiler_params=pltpu.CompilerParams(
            dimension_semantics=("parallel",),
        ),
    )(tbl, idx_slab)

    return out.reshape(-1)[:N].reshape(B, S)


def init_params(key):
    k1, k2, k3 = jax.random.split(key, 3)
    # nn.Embedding default init: N(0, 1)
    emb_table = jax.random.normal(k1, (VOCAB, DIM), dtype=jnp.float32)
    # nn.Linear default init: U(-1/sqrt(fan_in), 1/sqrt(fan_in))
    bound = 1.0 / (DIM ** 0.5)
    lin_w = jax.random.uniform(k2, (1, DIM), minval=-bound, maxval=bound, dtype=jnp.float32)
    lin_b = jax.random.uniform(k3, (1,), minval=-bound, maxval=bound, dtype=jnp.float32)
    return emb_table, lin_w, lin_b


def _reference(X, emb_table, lin_w, lin_b):
    e = jnp.maximum(emb_table[X], 0.0)                      # (B, S, DIM)
    return e @ lin_w.reshape(DIM) + lin_b[0]                # (B, S)


if __name__ == "__main__":
    key = jax.random.PRNGKey(0)
    k_param, k_idx1, k_idx2 = jax.random.split(key, 3)
    emb_table, lin_w, lin_b = init_params(k_param)

    # Small shape (B=2, S=8)
    B, S = 2, 8
    X = jax.random.randint(k_idx1, (B, S), 0, VOCAB, dtype=jnp.int32)
    out = jax.block_until_ready(emb_model_forward(X, emb_table, lin_w, lin_b))
    ref = _reference(X, emb_table, lin_w, lin_b)
    assert out.shape == (B, S)
    assert jnp.allclose(out, ref, atol=1e-5), "mismatch vs reference (small)"

    # Second shape exercising the padding path (N not a multiple of 128)
    B2, S2 = 3, 50
    X2 = jax.random.randint(k_idx2, (B2, S2), 0, VOCAB, dtype=jnp.int32)
    out2 = jax.block_until_ready(emb_model_forward(X2, emb_table, lin_w, lin_b))
    ref2 = _reference(X2, emb_table, lin_w, lin_b)
    assert out2.shape == (B2, S2)
    assert jnp.allclose(out2, ref2, atol=1e-5), "mismatch vs reference (padded)"

    print("KERNEL_OK")
</pallas_src>

<mosaic_0001>
module attributes {stable_mosaic.version = 11 : i64} {
  func.func @_lookup_kernel(%arg0: i32, %arg1: memref<10xf32, #tpu.memory_space<smem>>, %arg2: memref<8x128xi32, #tpu.memory_space<vmem>>, %arg3: memref<8x128xf32, #tpu.memory_space<vmem>>) attributes {dimension_semantics = [#tpu.dimension_semantics<parallel>], iteration_bounds = array<i64: 1>, scalar_prefetch = 0 : i64, scratch_operands = 0 : i64, tpu.core_type = #tpu.core_type<tc>, window_params = [{transform_indices = @transform_0, window_bounds = array<i64: 10>}, {transform_indices = @transform_1, window_bounds = array<i64: 8, 128>}, {transform_indices = @transform_2, window_bounds = array<i64: 8, 128>}]} {
    %c0 = arith.constant 0 : index
    %c0_0 = arith.constant 0 : index
    %0 = vector.load %arg2[%c0, %c0_0] : memref<8x128xi32, #tpu.memory_space<vmem>>, vector<8x128xi32>
    %cst = arith.constant 0.000000e+00 : f32
    %1 = vector.broadcast %cst : f32 to vector<8x128xf32>
    %c0_i32 = arith.constant 0 : i32
    %2 = vector.broadcast %c0_i32 : i32 to vector<8x128xi32>
    %3 = arith.cmpi eq, %0, %2 : vector<8x128xi32>
    %c0_1 = arith.constant 0 : index
    %4 = memref.load %arg1[%c0_1] : memref<10xf32, #tpu.memory_space<smem>>
    %5 = vector.broadcast %4 : f32 to vector<8x128xf32>
    %6 = arith.select %3, %5, %1 : vector<8x128xi1>, vector<8x128xf32>
    %c1_i32 = arith.constant 1 : i32
    %7 = vector.broadcast %c1_i32 : i32 to vector<8x128xi32>
    %8 = arith.cmpi eq, %0, %7 : vector<8x128xi32>
    %c1 = arith.constant 1 : index
    %9 = memref.load %arg1[%c1] : memref<10xf32, #tpu.memory_space<smem>>
    %10 = vector.broadcast %9 : f32 to vector<8x128xf32>
    %11 = arith.select %8, %10, %6 : vector<8x128xi1>, vector<8x128xf32>
    %c2_i32 = arith.constant 2 : i32
    %12 = vector.broadcast %c2_i32 : i32 to vector<8x128xi32>
    %13 = arith.cmpi eq, %0, %12 : vector<8x128xi32>
    %c2 = arith.constant 2 : index
    %14 = memref.load %arg1[%c2] : memref<10xf32, #tpu.memory_space<smem>>
    %15 = vector.broadcast %14 : f32 to vector<8x128xf32>
    %16 = arith.select %13, %15, %11 : vector<8x128xi1>, vector<8x128xf32>
    %c3_i32 = arith.constant 3 : i32
    %17 = vector.broadcast %c3_i32 : i32 to vector<8x128xi32>
    %18 = arith.cmpi eq, %0, %17 : vector<8x128xi32>
    %c3 = arith.constant 3 : index
    %19 = memref.load %arg1[%c3] : memref<10xf32, #tpu.memory_space<smem>>
    %20 = vector.broadcast %19 : f32 to vector<8x128xf32>
    %21 = arith.select %18, %20, %16 : vector<8x128xi1>, vector<8x128xf32>
    %c4_i32 = arith.constant 4 : i32
    %22 = vector.broadcast %c4_i32 : i32 to vector<8x128xi32>
    %23 = arith.cmpi eq, %0, %22 : vector<8x128xi32>
    %c4 = arith.constant 4 : index
    %24 = memref.load %arg1[%c4] : memref<10xf32, #tpu.memory_space<smem>>
    %25 = vector.broadcast %24 : f32 to vector<8x128xf32>
    %26 = arith.select %23, %25, %21 : vector<8x128xi1>, vector<8x128xf32>
    %c5_i32 = arith.constant 5 : i32
    %27 = vector.broadcast %c5_i32 : i32 to vector<8x128xi32>
    %28 = arith.cmpi eq, %0, %27 : vector<8x128xi32>
    %c5 = arith.constant 5 : index
    %29 = memref.load %arg1[%c5] : memref<10xf32, #tpu.memory_space<smem>>
    %30 = vector.broadcast %29 : f32 to vector<8x128xf32>
    %31 = arith.select %28, %30, %26 : vector<8x128xi1>, vector<8x128xf32>
    %c6_i32 = arith.constant 6 : i32
    %32 = vector.broadcast %c6_i32 : i32 to vector<8x128xi32>
    %33 = arith.cmpi eq, %0, %32 : vector<8x128xi32>
    %c6 = arith.constant 6 : index
    %34 = memref.load %arg1[%c6] : memref<10xf32, #tpu.memory_space<smem>>
    %35 = vector.broadcast %34 : f32 to vector<8x128xf32>
    %36 = arith.select %33, %35, %31 : vector<8x128xi1>, vector<8x128xf32>
    %c7_i32 = arith.constant 7 : i32
    %37 = vector.broadcast %c7_i32 : i32 to vector<8x128xi32>
    %38 = arith.cmpi eq, %0, %37 : vector<8x128xi32>
    %c7 = arith.constant 7 : index
    %39 = memref.load %arg1[%c7] : memref<10xf32, #tpu.memory_space<smem>>
    %40 = vector.broadcast %39 : f32 to vector<8x128xf32>
    %41 = arith.select %38, %40, %36 : vector<8x128xi1>, vector<8x128xf32>
    %c8_i32 = arith.constant 8 : i32
    %42 = vector.broadcast %c8_i32 : i32 to vector<8x128xi32>
    %43 = arith.cmpi eq, %0, %42 : vector<8x128xi32>
    %c8 = arith.constant 8 : index
    %44 = memref.load %arg1[%c8] : memref<10xf32, #tpu.memory_space<smem>>
    %45 = vector.broadcast %44 : f32 to vector<8x128xf32>
    %46 = arith.select %43, %45, %41 : vector<8x128xi1>, vector<8x128xf32>
    %c9_i32 = arith.constant 9 : i32
    %47 = vector.broadcast %c9_i32 : i32 to vector<8x128xi32>
    %48 = arith.cmpi eq, %0, %47 : vector<8x128xi32>
    %c9 = arith.constant 9 : index
    %49 = memref.load %arg1[%c9] : memref<10xf32, #tpu.memory_space<smem>>
    %50 = vector.broadcast %49 : f32 to vector<8x128xf32>
    %51 = arith.select %48, %50, %46 : vector<8x128xi1>, vector<8x128xf32>
    %c0_2 = arith.constant 0 : index
    %c0_3 = arith.constant 0 : index
    %52 = vector.load %arg3[%c0_2, %c0_3] : memref<8x128xf32, #tpu.memory_space<vmem>>, vector<8x128xf32>
    tpu.vector_store %arg3[%c0_2, %c0_3], %51 {strides = array<i32>} : memref<8x128xf32, #tpu.memory_space<vmem>>, vector<8x128xf32>,
    return
  }
  func.func @transform_0(%arg0: i32) -> i32 {
    %c0_i32 = arith.constant 0 : i32
    %c0_i32_0 = arith.constant 0 : i32
    return %c0_i32 : i32
  }
  func.func @transform_1(%arg0: i32) -> (i32, i32) {
    %c0_i32 = arith.constant 0 : i32
    %c0_i32_0 = arith.constant 0 : i32
    return %arg0, %c0_i32 : i32, i32
  }
  func.func @transform_2(%arg0: i32) -> (i32, i32) {
    %c0_i32 = arith.constant 0 : i32
    %c0_i32_0 = arith.constant 0 : i32
    return %arg0, %c0_i32 : i32, i32
  }
}

</mosaic_0001>

<bundles_post_ra>
// kernel: tpu_custom_call.1
= control target key start
LH: loop header
LB: loop body
LE: loop exit
PB: predicated region body
PF: predicated region fallthrough
CT: control target
= control target key end

     0   :  { %7 = vsyncpa [#allocation5], 0  ;;  %s231_s0 = inlined_call_operand.hbm [shape: f32[10], index: 0, kind: input, shape index: {}]   ;;  %s232_s1 = inlined_call_operand.hbm [shape: s32[8,128], index: 1, kind: input, shape index: {}]   ;;  %s233_s2 = inlined_call_operand.hbm [shape: f32[8,128], index: 2, kind: output, shape index: {}]  }
   0x1   :  { %8 = vsyncpa [#allocation3], 0 }
   0x2   :  { %9 = vsyncpa [#allocation4], 0  ;;  %s105_s11 = scalar_lea.hbm %s231_s0, 16 }
   0x3   :  { %p106_p0 = scmp.ne.s32.totalorder %s231_s0, %s105_s11  ;;  %p109_p1 = scmp.lt.u32.totalorder %s105_s11, %s231_s0 }
   0x5   :  { %p111_p2 = pnand %p109_p1, %p106_p0 }
   0x7   :  { %114 = shalt.err (!%p111_p2)
}
   0x8   :  { %s165_s16 = smov [#allocation2]   ;;  %s166_s19 = smov [#allocation6]  }
   0x9   :  { %17 = dma.hbm_to_smem %s231_s0, 16, %s165_s16, [#allocation5]  }
   0xa   :  { %s24_s20 = sshll.u32 %s166_s19, 4  ;;  %s115_s23 = scalar_lea.hbm %s232_s1, 128  ;;  %s25_s20 = int_to_ptr.vmem [resolvable:$true] %s24_s20 }
   0xb   :  { %p116_p3 = scmp.ne.s32.totalorder %s232_s1, %s115_s23  ;;  %p119_p4 = scmp.lt.u32.totalorder %s115_s23, %s232_s1 }
   0xd   :  { %p121_p5 = pnand %p119_p4, %p116_p3 }
   0xf   :  { %124 = shalt.err (!%p121_p5)
}
  0x10   :  { %s125_s28 = scalar_lea.vmem %s25_s20, 128  ;;  %p130_p7 = scmp.lt.s32.totalorder %s25_s20, %s25_s20 }
  0x11   :  { %p126_p6 = scmp.ne.s32.totalorder %s25_s20, %s125_s28  ;;  %p131_p8 = scmp.lt.s32.totalorder %s125_s28, %s125_s28 }
  0x13   :  { %p132_p9 = por %p131_p8, %p130_p7 }
  0x15   :  { %p133_p10 = pnand %p132_p9, %p126_p6 }
  0x17   :  { %136 = shalt.err (!%p133_p10)
}
  0x18   :  { %27 = dma.hbm_to_vmem [thread:$0]  %s232_s1, 128, %s25_s20, [#allocation3]  }
  0x19   :  { %159 = dma.done.wait [#allocation5], 16  }
  0x1a   :  { %160 = vsyncadd [#allocation5], 4294967280 }
  0x1b   :  { %161 = dma.done.wait [#allocation3], 128  }
  0x1c   :  { %162 = vsyncadd [#allocation3], 4294967168 }
  0x1d   :  { %34 = sfence }
  0x1e   :  { %s37_s30 = sld [smem:[#allocation2]]  ;;  %s93_s3 = sld [smem:[#allocation2 + $0x1]]  ;;  %v35_v0 = vld [vmem:[#allocation6] sm:$0xff] }
  0x1f   :  { %s94_s4 = sld [smem:[#allocation2 + $0x2]]  ;;  %s95_s5 = sld [smem:[#allocation2 + $0x3]]  ;;  %vm36_vm0 = vcmp.eq.s32.totalorder %v35_v0, 0  ;;  %vm40_vm1 = vcmp.eq.s32.totalorder %v35_v0, 1  ;;  %vm44_vm2 = vcmp.eq.s32.totalorder %v35_v0, 2  ;;  %vm48_vm3 = vcmp.eq.s32.totalorder %v35_v0, 3 }
  0x20   :  { %s96_s6 = sld [smem:[#allocation2 + $0x4]]  ;;  %s97_s7 = sld [smem:[#allocation2 + $0x5]]  ;;  %vm52_vm4 = vcmp.eq.s32.totalorder %v35_v0, 4  ;;  %vm56_vm5 = vcmp.eq.s32.totalorder %v35_v0, 5  ;;  %vm60_vm6 = vcmp.eq.s32.totalorder %v35_v0, 6  ;;  %vm64_vm7 = vcmp.eq.s32.totalorder %v35_v0, 7 }
  0x21   :  { %s207_s8 = sld [smem:[#allocation2 + $0x6]]  ;;  %s209_s9 = sld [smem:[#allocation2 + $0x7]]  ;;  %vm68_vm8 = vcmp.eq.s32.totalorder %v35_v0, 8  ;;  %vm72_vm9 = vcmp.eq.s32.totalorder %v35_v0, 9 }
  0x22   :  { %s211_s10 = sld [smem:[#allocation2 + $0x8]]  ;;  %s213_s1 = sld [smem:[#allocation2 + $0x9]] }
  0x23   :  { %s167_s11 = smov [#allocation7]  }
  0x24   :  { %v38_v1 = vstv %s37_s30  ;;  %v42_v2 = vstv %s93_s3  ;;  %s83_s12 = sshll.u32 %s167_s11, 4  ;;  %s84_s12 = int_to_ptr.vmem [resolvable:$true] %s83_s12 }
  0x25   :  { %v39_v3 = vsel %vm36_vm0, %v38_v1, 0.0  ;;  %v46_v4 = vstv %s94_s4  ;;  %v50_v6 = vstv %s95_s5  ;;  %s137_s13 = scalar_lea.vmem %s84_s12, 128  ;;  %p142_p12 = scmp.lt.s32.totalorder %s84_s12, %s84_s12 }
  0x26   :  { %v43_v5 = vsel %vm40_vm1, %v42_v2, %v39_v3  ;;  %v54_v7 = vstv %s96_s6  ;;  %v58_v9 = vstv %s97_s7  ;;  %p138_p11 = scmp.ne.s32.totalorder %s84_s12, %s137_s13  ;;  %p143_p13 = scmp.lt.s32.totalorder %s137_s13, %s137_s13 }
  0x27   :  { %v47_v8 = vsel %vm44_vm2, %v46_v4, %v43_v5  ;;  %v62_v11 = vstv %s207_s8  ;;  %v66_v13 = vstv %s209_s9 }
  0x28   :  { %v51_v10 = vsel %vm48_vm3, %v50_v6, %v47_v8  ;;  %v70_v15 = vstv %s211_s10  ;;  %v74_v17 = vstv %s213_s1  ;;  %p144_p0 = por %p143_p13, %p142_p12 }
  0x29   :  { %v55_v12 = vsel %vm52_vm4, %v54_v7, %v51_v10 }
  0x2a   :  { %v59_v14 = vsel %vm56_vm5, %v58_v9, %v55_v12  ;;  %p145_p1 = pnand %p144_p0, %p138_p11 }
  0x2b   :  { %v63_v16 = vsel %vm60_vm6, %v62_v11, %v59_v14 }
  0x2c   :  { %v67_v18 = vsel %vm64_vm7, %v66_v13, %v63_v16 }
  0x2d   :  { %v71_v19 = vsel %vm68_vm8, %v70_v15, %v67_v18 }
  0x2e   :  { %v75_v20 = vsel %vm72_vm9, %v74_v17, %v71_v19 }
  0x2f   :  { %76 = vst [vmem:[#allocation7] sm:$0xff] %v75_v20 }
  0x30   :  { %148 = shalt.err (!%p145_p1)
}
  0x31   :  { %s149_s16 = scalar_lea.hbm %s233_s2, 128 }
  0x32   :  { %p150_p2 = scmp.ne.s32.totalorder %s233_s2, %s149_s16  ;;  %p153_p3 = scmp.lt.u32.totalorder %s149_s16, %s233_s2 }
  0x34   :  { %p155_p4 = pnand %p153_p3, %p150_p2 }
  0x36   :  { %158 = shalt.err (!%p155_p4)
}
  0x37   :  { %86 = dma.vmem_to_hbm [thread:$0]  %s84_s12, 128, %s233_s2, [#allocation4]  }
  0x38   :  { %163 = dma.done.wait [#allocation4], 128  }
  0x39   :  { %164 = vsyncadd [#allocation4], 4294967168 }
  0x3a   :  { %90 = vsyncpa [#allocation3], 1 }
  0x3b   :  { %91 = vsyncpa [#allocation4], 1 }
  0x3c   :  { %92 = vsyncpa [#allocation5], 1 }

</bundles_post_ra>
